<compile_context>
chip_gen: v6e
topology: v6e:2x2x1
jax: 0.10.0
libtpu: 0.0.40
codegen_flags: <defaults>
</compile_context>

<pallas_src>
import functools

import jax
import jax.numpy as jnp
from jax import lax
from jax.experimental import pallas as pl
from jax.experimental.pallas import tpu as pltpu


_SQRT_HALF = 0.7071067811865476


def _gelu_exact(x):
    # nn.GELU() default (approximate='none'): 0.5 * x * (1 + erf(x / sqrt(2))).
    # NOTE(perf): lax.erf lowers to a VPU polynomial (no EUP erf); if the
    # bundle shows vmul (not vmatmul) saturated, switch to the tanh variant.
    return 0.5 * x * (1.0 + lax.erf(x * jnp.float32(_SQRT_HALF)))


def _gelu_tanh(x):
    return jax.nn.gelu(x, approximate=True)


def attn_ffn_kernel(x_ref, w1_ref, b1_ref, w2_ref, b2_ref, o_ref, acc_ref,
                    *, gelu_fn):
    """Grid point (i, k): row tile i (parallel), hidden slice k (reduction)."""
    hk = pl.program_id(1)

    @pl.when(hk == 0)
    def _init():
        acc_ref[...] = jnp.zeros_like(acc_ref)

    # fc1 slice + GELU.  MXU runs in the native (bf16) input dtype, f32 accum.
    h = jnp.dot(x_ref[...], w1_ref[...], preferred_element_type=jnp.float32)
    h = gelu_fn(h + b1_ref[...])            # b1 slice is (1, tile_h), broadcasts

    # dropout(p=0.1) -> identity in inference mode.

    # Partial fc2: accumulate this hidden slice's contribution in f32 VMEM.
    acc_ref[...] += jnp.dot(h.astype(w2_ref.dtype), w2_ref[...],
                            preferred_element_type=jnp.float32)

    @pl.when(hk == pl.num_programs(1) - 1)
    def _finalize():
        y = gelu_fn(acc_ref[...] + b2_ref[...])   # b2 is (1, E), f32
        o_ref[...] = y.astype(o_ref.dtype)


def _round_up(x, m):
    return ((x + m - 1) // m) * m


def _vmem_cap_bytes():
    """~75% of physical VMEM: 48 MiB on v7x (64 MiB phys), 96 MiB on v5e/v6e."""
    phys = 64 * 1024 * 1024
    try:
        info = pltpu.get_tpu_info()
        phys = int(getattr(info, "vmem_capacity_bytes", phys))
    except Exception:
        pass
    return (phys * 3) // 4


def _vmem_footprint(tm, th, E, x_item, w_item):
    """Real VMEM footprint of one grid step (double buffers included)."""
    return (2 * tm * E * x_item          # x tile, double-buffered
            + 2 * E * th * w_item        # W1 slab, double-buffered
            + 2 * th * E * w_item        # W2 slab, double-buffered
            + 2 * 8 * th * 4             # b1 slice (>= 8 sublanes, f32)
            + 2 * 8 * E * 4              # b2 (f32)
            + 2 * tm * E * x_item        # output tile, double-buffered
            + tm * E * 4)                # f32 accumulator scratch


def _plan_tiles(M, E, H, x_item, w_item, vmem_cap):
    ROW = 16                              # bf16: 2 rows / sublane
    M_min = _round_up(M, ROW)

    def fits(tm, th):
        return _vmem_footprint(tm, th, E, x_item, w_item) <= vmem_cap

    # (a) Tiny problems: one grid step, weights resident, no per-step overhead.
    if M_min <= 128 and fits(M_min, H):
        return M_min, H

    # (b) Weights-resident mode: tile_h = H makes the W1/W2 block index
    #     grid-invariant -> fetched from HBM exactly once.  Cap tile_m so the
    #     parallel row axis still has >= 2 tiles (v7x 2-TC sharding).
    half = _round_up(max(M_min // 2, ROW), ROW) if M_min >= 2 * ROW else M_min
    for cand in (1024, 512, 256, 128, 64, 32, 16):
        tm = min(cand, half)
        if tm % ROW == 0 and fits(tm, H):
            return tm, H

    # (c) Streamed-weights fallback (very large E*H): stream the hidden dim
    #     (tile_h >= 512 keeps the MXU full) and amortize the per-row-tile
    #     weight re-stream with the largest tile_m that fits.
    tile_h = H
    for cand in (2048, 1024, 512):
        if H % cand == 0:
            tile_h = cand
            break
    for cand in (1024, 512, 256, 128, 64, 32, 16):
        tm = min(cand, M_min)
        if tm % ROW == 0 and fits(tm, tile_h):
            return tm, tile_h
    return ROW, tile_h                    # last resort; correct, may spill


def attn_ffn(x2d, w1, b1, w2, b2, *, compute_dtype=jnp.bfloat16,
             tile_m=None, tile_h=None, use_approx_gelu=False):
    """x2d: [M, E].  w1: [E, H], b1: [H], w2: [H, E], b2: [E]."""
    M, E = x2d.shape
    H = w1.shape[1]
    out_dtype = x2d.dtype

    # Feed the MXU bf16 (f32 accumulate / epilogue stay as-is).
    if compute_dtype is not None:
        x2d = x2d.astype(compute_dtype)
        w1 = w1.astype(compute_dtype)
        w2 = w2.astype(compute_dtype)

    x_item = jnp.dtype(x2d.dtype).itemsize
    w_item = jnp.dtype(w1.dtype).itemsize

    vmem_cap = _vmem_cap_bytes()
    auto_tm, auto_th = _plan_tiles(M, E, H, x_item, w_item, vmem_cap)
    tile_m = auto_tm if tile_m is None else tile_m
    tile_h = auto_th if tile_h is None else tile_h
    assert tile_m % 16 == 0, "row tile must be a multiple of 16 (bf16 packing)"
    assert H % tile_h == 0, "tile_h must divide the hidden dim"

    # Pad ragged row counts so the grid is exact.  Padded rows compute
    # gelu(bias)-flavoured garbage; they are sliced off below and never read.
    M_pad = _round_up(M, tile_m)
    if M_pad != M:
        x2d = jnp.pad(x2d, ((0, M_pad - M), (0, 0)))

    b1_2d = b1.astype(jnp.float32).reshape(1, H)
    b2_2d = b2.astype(jnp.float32).reshape(1, E)

    n_row_tiles = M_pad // tile_m
    grid = (n_row_tiles, H // tile_h)

    # ---- VMEM request: actual footprint (+ headroom), capped at 75% physical.
    footprint = _vmem_footprint(tile_m, tile_h, E, x_item, w_item)
    vmem_limit = int(min(max(int(footprint * 1.25), 32 * 1024 * 1024), vmem_cap))

    # ---- Cost hint: weights read once (resident) or once per row tile (streamed).
    weight_reads = 1 if tile_h == H else n_row_tiles
    cost = pl.CostEstimate(
        flops=4 * M_pad * E * H,                            # two matmuls
        transcendentals=M_pad * (H + E),                    # erf/tanh per GELU elem
        bytes_accessed=int(M_pad * E * x_item * 2           # x in + y out
                           + weight_reads * 2 * E * H * w_item
                           + (H + E) * 4),                  # biases
    )

    gelu_fn = _gelu_tanh if use_approx_gelu else _gelu_exact
    kernel = functools.partial(attn_ffn_kernel, gelu_fn=gelu_fn)

    out = pl.pallas_call(
        kernel,
        out_shape=jax.ShapeDtypeStruct((M_pad, E), out_dtype),
        grid_spec=pltpu.PrefetchScalarGridSpec(
            num_scalar_prefetch=0,
            grid=grid,
            in_specs=[
                pl.BlockSpec((tile_m, E), lambda i, k: (i, 0)),   # x row tile
                pl.BlockSpec((E, tile_h), lambda i, k: (0, k)),   # W1[:, h slice]
                pl.BlockSpec((1, tile_h), lambda i, k: (0, k)),   # b1[h slice]
                pl.BlockSpec((tile_h, E), lambda i, k: (k, 0)),   # W2[h slice, :]
                pl.BlockSpec((1, E),      lambda i, k: (0, 0)),   # b2 (invariant)
            ],
            out_specs=pl.BlockSpec((tile_m, E), lambda i, k: (i, 0)),
            scratch_shapes=[pltpu.VMEM((tile_m, E), jnp.float32)],
        ),
        compiler_params=pltpu.CompilerParams(
            dimension_semantics=("parallel", "arbitrary"),
            vmem_limit_bytes=vmem_limit,
        ),
        cost_estimate=cost,
    )(x2d, w1, b1_2d, w2, b2_2d)

    return out[:M] if M_pad != M else out


def attn_ffn_ref(x2d, w1, b1, w2, b2):
    """Pure-JAX f32 reference (inference mode, exact GELU)."""
    h = jax.nn.gelu(x2d @ w1 + b1, approximate=False)
    y = jax.nn.gelu(h @ w2 + b2, approximate=False)
    return y


if __name__ == "__main__":
    # Small shapes consistent with the module.  embed_dim=128 keeps the output
    # block lane-dense; M=16 rows collapses to a single grid step with the
    # weights fully VMEM-resident (fetched from HBM exactly once).
    batch, seq, embed_dim = 2, 8, 128
    hidden = int(embed_dim * 4)  # 512

    key = jax.random.PRNGKey(0)
    kx, k1, k2, k3, k4 = jax.random.split(key, 5)

    # Deterministic "Linear-like" init (uniform in +/- 1/sqrt(fan_in)).
    bound1 = 1.0 / jnp.sqrt(embed_dim)
    bound2 = 1.0 / jnp.sqrt(hidden)
    w1 = jax.random.uniform(k1, (embed_dim, hidden), jnp.float32, -bound1, bound1)
    b1 = jax.random.uniform(k2, (hidden,), jnp.float32, -bound1, bound1)
    w2 = jax.random.uniform(k3, (hidden, embed_dim), jnp.float32, -bound2, bound2)
    b2 = jax.random.uniform(k4, (embed_dim,), jnp.float32, -bound2, bound2)

    x = jax.random.normal(kx, (batch, seq, embed_dim), jnp.float32)

    # Flatten leading dims (glue); kernel works on [M, E] token rows.
    x2d = x.reshape(batch * seq, embed_dim)

    y2d = attn_ffn(x2d, w1, b1, w2, b2)          # bf16 MXU, f32 accumulate
    y2d = jax.block_until_ready(y2d)
    y = y2d.reshape(batch, seq, embed_dim)

    # Correctness vs pure-f32 reference; tolerance widened for bf16 MXU inputs.
    y_ref = attn_ffn_ref(x2d, w1, b1, w2, b2).reshape(batch, seq, embed_dim)
    assert y.shape == (batch, seq, embed_dim)
    assert jnp.allclose(y, y_ref, atol=1e-2, rtol=1e-2), "mismatch vs reference"

    print("KERNEL_OK")
</pallas_src>

<mosaic_0001>
module attributes {stable_mosaic.version = 11 : i64} {
  func.func @attn_ffn_kernel(%arg0: i32, %arg1: i32, %arg2: memref<16x128xbf16, #tpu.memory_space<vmem>>, %arg3: memref<128x512xbf16, #tpu.memory_space<vmem>>, %arg4: memref<1x512xf32, #tpu.memory_space<vmem>>, %arg5: memref<512x128xbf16, #tpu.memory_space<vmem>>, %arg6: memref<1x128xf32, #tpu.memory_space<vmem>>, %arg7: memref<16x128xf32, #tpu.memory_space<vmem>>, %arg8: memref<16x128xf32, #tpu.memory_space<vmem>>) attributes {dimension_semantics = [#tpu.dimension_semantics<parallel>, #tpu.dimension_semantics<arbitrary>], iteration_bounds = array<i64: 1, 1>, scalar_prefetch = 0 : i64, scratch_operands = 1 : i64, tpu.core_type = #tpu.core_type<tc>, window_params = [{transform_indices = @transform_0, window_bounds = array<i64: 16, 128>}, {transform_indices = @transform_1, window_bounds = array<i64: 128, 512>}, {transform_indices = @transform_2, window_bounds = array<i64: 1, 512>}, {transform_indices = @transform_3, window_bounds = array<i64: 512, 128>}, {pipeline_mode = #tpu.pipeline_mode<synchronous>, transform_indices = @transform_4, window_bounds = array<i64: 1, 128>}, {transform_indices = @transform_5, window_bounds = array<i64: 16, 128>}]} {
    %c0_i32 = arith.constant 0 : i32
    %0 = arith.cmpi eq, %arg1, %c0_i32 : i32
    %1 = arith.extui %0 : i1 to i32
    %c0_i32_0 = arith.constant 0 : i32
    %2 = arith.cmpi ne, %1, %c0_i32_0 : i32
    scf.if %2 {
      %cst_18 = arith.constant 0.000000e+00 : f32
      %26 = vector.broadcast %cst_18 : f32 to vector<16x128xf32>
      %c0_19 = arith.constant 0 : index
      %c0_20 = arith.constant 0 : index
      %27 = vector.load %arg8[%c0_19, %c0_20] : memref<16x128xf32, #tpu.memory_space<vmem>>, vector<16x128xf32>
      tpu.vector_store %arg8[%c0_19, %c0_20], %26 {strides = array<i32>} : memref<16x128xf32, #tpu.memory_space<vmem>>, vector<16x128xf32>,
    } else {
    }
    %c0 = arith.constant 0 : index
    %c0_1 = arith.constant 0 : index
    %3 = vector.load %arg2[%c0, %c0_1] : memref<16x128xbf16, #tpu.memory_space<vmem>>, vector<16x128xbf16>
    %c0_2 = arith.constant 0 : index
    %c0_3 = arith.constant 0 : index
    %4 = vector.load %arg3[%c0_2, %c0_3] : memref<128x512xbf16, #tpu.memory_space<vmem>>, vector<128x512xbf16>
    %cst = arith.constant dense<0.000000e+00> : vector<16x512xf32>
    %5 = tpu.matmul %3, %4, %cst {dimension_numbers = #tpu.dot_dimension_numbers<[1], [0], [0], [1], [0, 0, 1, 1], [], []>} : vector<16x128xbf16>, vector<128x512xbf16>, vector<16x512xf32> -> vector<16x512xf32>
    %c0_4 = arith.constant 0 : index
    %c0_5 = arith.constant 0 : index
    %6 = vector.load %arg4[%c0_4, %c0_5] : memref<1x512xf32, #tpu.memory_space<vmem>>, vector<1x512xf32>
    %7 = vector.broadcast %6 : vector<1x512xf32> to vector<16x512xf32>
    %8 = arith.addf %5, %7 : vector<16x512xf32>
    %cst_6 = arith.constant 5.000000e-01 : f32
    %9 = vector.broadcast %cst_6 : f32 to vector<16x512xf32>
    %10 = arith.mulf %9, %8 : vector<16x512xf32>
    %cst_7 = arith.constant 0.707106769 : f32
    %11 = vector.broadcast %cst_7 : f32 to vector<16x512xf32>
    %12 = arith.mulf %8, %11 : vector<16x512xf32>
    %13 = math.erf %12 : vector<16x512xf32>
    %cst_8 = arith.constant 1.000000e+00 : f32
    %14 = vector.broadcast %cst_8 : f32 to vector<16x512xf32>
    %15 = arith.addf %14, %13 : vector<16x512xf32>
    %16 = arith.mulf %10, %15 : vector<16x512xf32>
    %c0_9 = arith.constant 0 : index
    %c0_10 = arith.constant 0 : index
    %17 = vector.load %arg8[%c0_9, %c0_10] : memref<16x128xf32, #tpu.memory_space<vmem>>, vector<16x128xf32>
    %18 = arith.truncf %16 : vector<16x512xf32> to vector<16x512xbf16>
    %c0_11 = arith.constant 0 : index
    %c0_12 = arith.constant 0 : index
    %19 = vector.load %arg5[%c0_11, %c0_12] : memref<512x128xbf16, #tpu.memory_space<vmem>>, vector<512x128xbf16>
    %cst_13 = arith.constant dense<0.000000e+00> : vector<16x128xf32>
    %20 = tpu.matmul %18, %19, %cst_13 {dimension_numbers = #tpu.dot_dimension_numbers<[1], [0], [0], [1], [0, 0, 1, 1], [], []>} : vector<16x512xbf16>, vector<512x128xbf16>, vector<16x128xf32> -> vector<16x128xf32>
    %21 = arith.addf %17, %20 : vector<16x128xf32>
    %c0_14 = arith.constant 0 : index
    %c0_15 = arith.constant 0 : index
    %22 = vector.load %arg8[%c0_14, %c0_15] : memref<16x128xf32, #tpu.memory_space<vmem>>, vector<16x128xf32>
    tpu.vector_store %arg8[%c0_14, %c0_15], %21 {strides = array<i32>} : memref<16x128xf32, #tpu.memory_space<vmem>>, vector<16x128xf32>,
    %c0_i32_16 = arith.constant 0 : i32
    %23 = arith.cmpi eq, %arg1, %c0_i32_16 : i32
    %24 = arith.extui %23 : i1 to i32
    %c0_i32_17 = arith.constant 0 : i32
    %25 = arith.cmpi ne, %24, %c0_i32_17 : i32
    scf.if %25 {
      %c0_18 = arith.constant 0 : index
      %c0_19 = arith.constant 0 : index
      %26 = vector.load %arg8[%c0_18, %c0_19] : memref<16x128xf32, #tpu.memory_space<vmem>>, vector<16x128xf32>
      %c0_20 = arith.constant 0 : index
      %c0_21 = arith.constant 0 : index
      %27 = vector.load %arg6[%c0_20, %c0_21] : memref<1x128xf32, #tpu.memory_space<vmem>>, vector<1x128xf32>
      %28 = vector.broadcast %27 : vector<1x128xf32> to vector<16x128xf32>
      %29 = arith.addf %26, %28 : vector<16x128xf32>
      %cst_22 = arith.constant 5.000000e-01 : f32
      %30 = vector.broadcast %cst_22 : f32 to vector<16x128xf32>
      %31 = arith.mulf %30, %29 : vector<16x128xf32>
      %cst_23 = arith.constant 0.707106769 : f32
      %32 = vector.broadcast %cst_23 : f32 to vector<16x128xf32>
      %33 = arith.mulf %29, %32 : vector<16x128xf32>
      %34 = math.erf %33 : vector<16x128xf32>
      %cst_24 = arith.constant 1.000000e+00 : f32
      %35 = vector.broadcast %cst_24 : f32 to vector<16x128xf32>
      %36 = arith.addf %35, %34 : vector<16x128xf32>
      %37 = arith.mulf %31, %36 : vector<16x128xf32>
      %c0_25 = arith.constant 0 : index
      %c0_26 = arith.constant 0 : index
      %38 = vector.load %arg7[%c0_25, %c0_26] : memref<16x128xf32, #tpu.memory_space<vmem>>, vector<16x128xf32>
      tpu.vector_store %arg7[%c0_25, %c0_26], %37 {strides = array<i32>} : memref<16x128xf32, #tpu.memory_space<vmem>>, vector<16x128xf32>,
    } else {
    }
    return
  }
  func.func @transform_0(%arg0: i32, %arg1: i32) -> (i32, i32) {
    %c0_i32 = arith.constant 0 : i32
    %c0_i32_0 = arith.constant 0 : i32
    return %arg0, %c0_i32 : i32, i32
  }
  func.func @transform_1(%arg0: i32, %arg1: i32) -> (i32, i32) {
    %c0_i32 = arith.constant 0 : i32
    %c0_i32_0 = arith.constant 0 : i32
    return %c0_i32, %arg1 : i32, i32
  }
  func.func @transform_2(%arg0: i32, %arg1: i32) -> (i32, i32) {
    %c0_i32 = arith.constant 0 : i32
    %c0_i32_0 = arith.constant 0 : i32
    return %c0_i32, %arg1 : i32, i32
  }
  func.func @transform_3(%arg0: i32, %arg1: i32) -> (i32, i32) {
    %c0_i32 = arith.constant 0 : i32
    %c0_i32_0 = arith.constant 0 : i32
    return %arg1, %c0_i32 : i32, i32
  }
  func.func @transform_4(%arg0: i32, %arg1: i32) -> (i32, i32) {
    %c0_i32 = arith.constant 0 : i32
    %c0_i32_0 = arith.constant 0 : i32
    %c0_i32_1 = arith.constant 0 : i32
    return %c0_i32, %c0_i32_0 : i32, i32
  }
  func.func @transform_5(%arg0: i32, %arg1: i32) -> (i32, i32) {
    %c0_i32 = arith.constant 0 : i32
    %c0_i32_0 = arith.constant 0 : i32
    return %arg0, %c0_i32 : i32, i32
  }
}

</mosaic_0001>

<bundles_post_ra>
// kernel: tpu_custom_call.1
= control target key start
LH: loop header
LB: loop body
LE: loop exit
PB: predicated region body
PF: predicated region fallthrough
CT: control target
= control target key end

     0   :  { %10 = vsyncpa [#allocation4], 0  ;;  %s1213_s0 = inlined_call_operand.hbm [shape: bf16[16,128], index: 0, kind: input, shape index: {}]   ;;  %s1214_s1 = inlined_call_operand.hbm [shape: bf16[128,512], index: 1, kind: input, shape index: {}]   ;;  %s1215_s2 = inlined_call_operand.hbm [shape: f32[1,512], index: 2, kind: input, shape index: {}]   ;;  %s1216_s3 = inlined_call_operand.hbm [shape: bf16[512,128], index: 3, kind: input, shape index: {}]   ;;  %s1217_s4 = inlined_call_operand.vmem [shape: f32[1,128], index: 4, kind: input, shape index: {}]   ;;  %s1218_s5 = inlined_call_operand.hbm [shape: f32[16,128], index: 5, kind: output, shape index: {}]  }
   0x1   :  { %11 = vsyncpa [#allocation7], 0 }
   0x2   :  { %12 = vsyncpa [#allocation10], 0 }
   0x3   :  { %13 = vsyncpa [#allocation5], 0  ;;  %s1153_s18 = smov [#allocation6]  }
   0x4   :  { %s31_s19 = sshll.u32 %s1153_s18, 4  ;;  %s32_s19 = int_to_ptr.vmem [resolvable:$true] %s31_s19 }
   0x5   :  { %s1053_s20 = scalar_lea.vmem %s32_s19, 4096  ;;  %p1058_p1 = scmp.lt.s32.totalorder %s32_s19, %s32_s19 }
   0x6   :  { %p1054_p0 = scmp.ne.s32.totalorder %s32_s19, %s1053_s20  ;;  %p1059_p2 = scmp.lt.s32.totalorder %s1053_s20, %s1053_s20 }
   0x8   :  { %p1060_p3 = por %p1059_p2, %p1058_p1 }
   0xa   :  { %p1061_p4 = pnand %p1060_p3, %p1054_p0 }
   0xc   :  { %1064 = shalt.err (!%p1061_p4)
}
   0xd   :  { %s1154_s21 = smov 256   ;;  %s1155_s22 = smov 16  }
   0xe   :  { %37 = dma.hbm_to_vmem [thread:$0]  %s1214_s1, 4096, %s32_s19, [#allocation7], %s1154_s21, %s1154_s21, %s1155_s22  }
   0xf   :  { %s1156_s25 = smov [#allocation3]  }
  0x10   :  { %s19_s26 = sshll.u32 %s1156_s25, 4  ;;  %s20_s26 = int_to_ptr.vmem [resolvable:$true] %s19_s26 }
  0x11   :  { %s1073_s27 = scalar_lea.vmem %s20_s26, 128  ;;  %p1078_p6 = scmp.lt.s32.totalorder %s20_s26, %s20_s26 }
  0x12   :  { %p1074_p5 = scmp.ne.s32.totalorder %s20_s26, %s1073_s27  ;;  %p1079_p7 = scmp.lt.s32.totalorder %s1073_s27, %s1073_s27 }
  0x14   :  { %p1080_p8 = por %p1079_p7, %p1078_p6 }
  0x16   :  { %p1081_p9 = pnand %p1080_p8, %p1074_p5 }
  0x18   :  { %1084 = shalt.err (!%p1081_p9)
}
  0x19   :  { %s1157_s28 = smov 64   ;;  %s1158_s29 = smov 4  }
  0x1a   :  { %25 = dma.hbm_to_vmem [thread:$0]  %s1213_s0, 128, %s20_s26, [#allocation4], %s1157_s28, %s1157_s28, %s1158_s29  }
  0x1b   :  { %s1159_s7 = smov [#allocation8]   ;;  %s1160_s9 = smov [#allocation9]  }
  0x1c   :  { %s44_s8 = sshll.u32 %s1159_s7, 4  ;;  %s53_s1 = sshll.u32 %s1160_s9, 4  ;;  %s45_s8 = int_to_ptr.vmem [resolvable:$true] %s44_s8  ;;  %s54_s1 = int_to_ptr.vmem [resolvable:$true] %s53_s1 }
  0x1d   :  { %s1093_s10 = scalar_lea.vmem %s45_s8, 64  ;;  %p1098_p11 = scmp.lt.s32.totalorder %s45_s8, %s45_s8 }
  0x1e   :  { %p1094_p10 = scmp.ne.s32.totalorder %s45_s8, %s1093_s10  ;;  %p1099_p12 = scmp.lt.s32.totalorder %s1093_s10, %s1093_s10 }
  0x20   :  { %p1100_p13 = por %p1099_p12, %p1098_p11 }
  0x22   :  { %p1101_p0 = pnand %p1100_p13, %p1094_p10 }
  0x24   :  { %1104 = shalt.err (!%p1101_p0)
}
  0x25   :  { %47 = dma.hbm_to_vmem [thread:$0]  %s1215_s2, 64, %s45_s8, [#allocation7]  }
  0x26   :  { %s1113_s13 = scalar_lea.vmem %s54_s1, 4096  ;;  %p1118_p2 = scmp.lt.s32.totalorder %s54_s1, %s54_s1 }
  0x27   :  { %p1114_p1 = scmp.ne.s32.totalorder %s54_s1, %s1113_s13  ;;  %p1119_p3 = scmp.lt.s32.totalorder %s1113_s13, %s1113_s13 }
  0x29   :  { %p1120_p4 = por %p1119_p3, %p1118_p2 }
  0x2b   :  { %p1121_p5 = pnand %p1120_p4, %p1114_p1 }
  0x2d   :  { %1124 = shalt.err (!%p1121_p5)
}
  0x2e   :  { %59 = dma.hbm_to_vmem [thread:$0]  %s1216_s3, 4096, %s54_s1, [#allocation10], %s1157_s28, %s1157_s28, %s1158_s29  }
  0x2f   :  { %1145 = dma.done.wait [#allocation4], 128  }
  0x30   :  { %1146 = vsyncadd [#allocation4], 4294967168 }
  0x31   :  { %1147 = dma.done.wait [#allocation7], 4160  }
  0x32   :  { %1148 = vsyncadd [#allocation7], 4294963136 }
  0x33   :  { %1149 = dma.done.wait [#allocation10], 4096  }
  0x34   :  { %1150 = vsyncadd [#allocation10], 4294963200  ;;  %v1161_v0 = vmov 0   ;;  %v944_v1 = vld [vmem:[#allocation6 + $0xe4] ss:$16 sps:$4 sm:$0xff]   ;;  %v992_v33 = vld [vmem:[#allocation3] sm:$0xff]  }
  0x35   :  { %335 = vmatprep.mubr.bf16.mxu0 %v1161_v0  ;;  %378 = vmatprep.mubr.bf16.mxu1 %v1161_v0  ;;  %v946_v2 = vld [vmem:[#allocation6 + $0xec] ss:$16 sps:$4 sm:$0xff]   ;;  %v948_v3 = vld [vmem:[#allocation6 + $0xe0] ss:$16 sps:$4 sm:$0xff]   ;;  %v949_v4 = vld [vmem:[#allocation6 + $0xe8] ss:$16 sps:$4 sm:$0xff]  }
  0x36   :  { %303 = vmatprep.subr.bf16.mxu0 %v944_v1  ;;  %346 = vmatprep.subr.bf16.mxu1 %v946_v2  ;;  %v950_v5 = vld [vmem:[#allocation6 + $0xc4] ss:$16 sps:$4 sm:$0xff]   ;;  %v952_v6 = vld [vmem:[#allocation6 + $0xcc] ss:$16 sps:$4 sm:$0xff]   ;;  %v954_v7 = vld [vmem:[#allocation6 + $0xc0] ss:$16 sps:$4 sm:$0xff]   ;;  %v117_v2 = vlaneseq }
  0x37   :  { %304 = vmatpush1.bf16.msra.mxu0 %v948_v3  ;;  %347 = vmatpush1.bf16.msra.mxu1 %v949_v4  ;;  %v955_v8 = vld [vmem:[#allocation6 + $0xc8] ss:$16 sps:$4 sm:$0xff]   ;;  %v956_v9 = vld [vmem:[#allocation6 + $0xa4] ss:$16 sps:$4 sm:$0xff]   ;;  %v958_v10 = vld [vmem:[#allocation6 + $0xac] ss:$16 sps:$4 sm:$0xff]  }
  0x38   :  { %305 = vmatprep.subr.bf16.mxu0 %v950_v5  ;;  %348 = vmatprep.subr.bf16.mxu1 %v952_v6  ;;  %v960_v11 = vld [vmem:[#allocation6 + $0xa0] ss:$16 sps:$4 sm:$0xff]   ;;  %v961_v12 = vld [vmem:[#allocation6 + $0xa8] ss:$16 sps:$4 sm:$0xff]   ;;  %v962_v13 = vld [vmem:[#allocation6 + $0x84] ss:$16 sps:$4 sm:$0xff]  }
  0x39   :  { %v964_v14 = vld [vmem:[#allocation6 + $0x8c] ss:$16 sps:$4 sm:$0xff]   ;;  %v966_v15 = vld [vmem:[#allocation6 + $0x80] ss:$16 sps:$4 sm:$0xff]   ;;  %v967_v16 = vld [vmem:[#allocation6 + $0x88] ss:$16 sps:$4 sm:$0xff]  }
  0x3a   :  { %v968_v17 = vld [vmem:[#allocation6 + $0x64] ss:$16 sps:$4 sm:$0xff]   ;;  %v970_v18 = vld [vmem:[#allocation6 + $0x6c] ss:$16 sps:$4 sm:$0xff]   ;;  %v972_v19 = vld [vmem:[#allocation6 + $0x60] ss:$16 sps:$4 sm:$0xff]  }
  0x3b   :  { %306 = vmatpush1.bf16.msra.mxu0 %v954_v7  ;;  %349 = vmatpush1.bf16.msra.mxu1 %v955_v8  ;;  %v973_v20 = vld [vmem:[#allocation6 + $0x68] ss:$16 sps:$4 sm:$0xff]   ;;  %v974_v21 = vld [vmem:[#allocation6 + $0x44] ss:$16 sps:$4 sm:$0xff]   ;;  %v976_v22 = vld [vmem:[#allocation6 + $0x4c] ss:$16 sps:$4 sm:$0xff]  }
  0x3c   :  { %307 = vmatprep.subr.bf16.mxu0 %v956_v9  ;;  %350 = vmatprep.subr.bf16.mxu1 %v958_v10  ;;  %v978_v23 = vld [vmem:[#allocation6 + $0x40] ss:$16 sps:$4 sm:$0xff]   ;;  %v979_v24 = vld [vmem:[#allocation6 + $0x48] ss:$16 sps:$4 sm:$0xff]   ;;  %v980_v25 = vld [vmem:[#allocation6 + $0x24] ss:$16 sps:$4 sm:$0xff]  }
  0x3d   :  { %v982_v26 = vld [vmem:[#allocation6 + $0x2c] ss:$16 sps:$4 sm:$0xff]   ;;  %v984_v27 = vld [vmem:[#allocation6 + $0x20] ss:$16 sps:$4 sm:$0xff]   ;;  %v985_v28 = vld [vmem:[#allocation6 + $0x28] ss:$16 sps:$4 sm:$0xff]  }
  0x3e   :  { %v986_v29 = vld [vmem:[#allocation6 + $0x4] ss:$16 sps:$4 sm:$0xff]   ;;  %v988_v30 = vld [vmem:[#allocation6 + $0xc] ss:$16 sps:$4 sm:$0xff]   ;;  %v990_v31 = vld [vmem:[#allocation6] ss:$16 sps:$4 sm:$0xff]  }
  0x3f   :  { %308 = vmatpush1.bf16.msra.mxu0 %v960_v11  ;;  %351 = vmatpush1.bf16.msra.mxu1 %v961_v12  ;;  %v991_v32 = vld [vmem:[#allocation6 + $0x8] ss:$16 sps:$4 sm:$0xff]   ;;  %v993_v34 = vld [vmem:[#allocation9 + $0x78] sm:$0xff]   ;;  %v1001_v42 = vld [vmem:[#allocation9 + $0x68] sm:$0xff]   ;;  %v118_v3 = vshrl.u32 %v117_v2, 7  ;;  %s1162_s15 = smov [#allocation11]  }
  0x40   :  { %309 = vmatprep.subr.bf16.mxu0 %v962_v13  ;;  %352 = vmatprep.subr.bf16.mxu1 %v964_v14  ;;  %v994_v35 = vld [vmem:[#allocation9 + $0xf8] sm:$0xff]   ;;  %v997_v38 = vld [vmem:[#allocation9 + $0x70] sm:$0xff]   ;;  %v1002_v43 = vld [vmem:[#allocation9 + $0xe8] sm:$0xff]   ;;  %s808_s16 = sshll.u32 %s1162_s15, 4  ;;  %s809_s16 = int_to_ptr.vmem [resolvable:$true] %s808_s16 }
  0x41   :  { %v995_v36 = vld [vmem:[#allocation9 + $0x38] sm:$0xff]   ;;  %v998_v39 = vld [vmem:[#allocation9 + $0xf0] sm:$0xff]   ;;  %v1003_v44 = vld [vmem:[#allocation9 + $0x28] sm:$0xff]   ;;  %v119_v4 = vsub.s32 0, %v118_v3  ;;  %v127_v5 = vsub.s32 2, %v118_v3  ;;  %v123_v7 = vsub.s32 1, %v118_v3  ;;  %p1130_p7 = scmp.lt.s32.totalorder %s809_s16, %s809_s16 }
  0x42   :  { %v996_v37 = vld [vmem:[#allocation9 + $0xb8] sm:$0xff]   ;;  %v999_v40 = vld [vmem:[#allocation9 + $0x30] sm:$0xff]   ;;  %v1004_v45 = vld [vmem:[#allocation9 + $0xa8] sm:$0xff]   ;;  %v131_v8 = vsub.s32 3, %v118_v3 }
  0x43   :  { %310 = vmatpush1.bf16.msra.mxu0 %v966_v15  ;;  %353 = vmatpush1.bf16.msra.mxu1 %v967_v16  ;;  %v1000_v41 = vld [vmem:[#allocation9 + $0xb0] sm:$0xff]   ;;  %v1005_v46 = vld [vmem:[#allocation9 + $0x60] sm:$0xff]   ;;  %v1009_v50 = vld [vmem:[#allocation9 + $0x58] sm:$0xff]  }
  0x44   :  { %311 = vmatprep.subr.bf16.mxu0 %v968_v17  ;;  %354 = vmatprep.subr.bf16.mxu1 %v970_v18  ;;  %v1006_v47 = vld [vmem:[#allocation9 + $0xe0] sm:$0xff]   ;;  %v1010_v51 = vld [vmem:[#allocation9 + $0xd8] sm:$0xff]   ;;  %v1013_v54 = vld [vmem:[#allocation9 + $0x50] sm:$0xff]  }
  0x45   :  { %v1007_v48 = vld [vmem:[#allocation9 + $0x20] sm:$0xff]   ;;  %v1011_v52 = vld [vmem:[#allocation9 + $0x18] sm:$0xff]   ;;  %v1014_v55 = vld [vmem:[#allocation9 + $0xd0] sm:$0xff]  }
  0x46   :  { %v1008_v49 = vld [vmem:[#allocation9 + $0xa0] sm:$0xff]   ;;  %v1012_v53 = vld [vmem:[#allocation9 + $0x98] sm:$0xff]   ;;  %v1015_v56 = vld [vmem:[#allocation9 + $0x10] sm:$0xff]  }
  0x47   :  { %312 = vmatpush1.bf16.msra.mxu0 %v972_v19  ;;  %355 = vmatpush1.bf16.msra.mxu1 %v973_v20  ;;  %v1016_v57 = vld [vmem:[#allocation9 + $0x90] sm:$0xff]   ;;  %v1017_v58 = vld [vmem:[#allocation9 + $0x48] sm:$0xff]   ;;  %v1021_v62 = vld [vmem:[#allocation9 + $0x40] sm:$0xff]  }
  0x48   :  { %313 = vmatprep.subr.bf16.mxu0 %v974_v21  ;;  %356 = vmatprep.subr.bf16.mxu1 %v976_v22  ;;  %v1018_v59 = vld [vmem:[#allocation9 + $0xc8] sm:$0xff]   ;;  %v1022_v63 = vld [vmem:[#allocation9 + $0xc0] sm:$0xff]   ;;  %v115_v6 = vld [vmem:[#allocation8] sm:$0xf] }
  0x49   :  { %v1019_v60 = vld [vmem:[#allocation9 + $0x8] sm:$0xff]   ;;  %v1023_v0 = vld [vmem:[#allocation9] sm:$0xff]   ;;  %v120_v9 = vrot.slane %v115_v6, %v119_v4  ;;  %v128_v10 = vrot.slane %v115_v6, %v127_v5  ;;  %v124_v13 = vrot.slane %v115_v6, %v123_v7  ;;  %v132_v14 = vrot.slane %v115_v6, %v131_v8 }
  0x4a   :  { %v1020_v61 = vld [vmem:[#allocation9 + $0x88] sm:$0xff]   ;;  %v1024_v1 = vld [vmem:[#allocation9 + $0x80] sm:$0xff]  }
  0x4b   :  { %314 = vmatpush1.bf16.msra.mxu0 %v978_v23  ;;  %357 = vmatpush1.bf16.msra.mxu1 %v979_v24 }
  0x4c   :  { %315 = vmatprep.subr.bf16.mxu0 %v980_v25  ;;  %358 = vmatprep.subr.bf16.mxu1 %v982_v26 }
  0x4f   :  { %316 = vmatpush1.bf16.msra.mxu0 %v984_v27  ;;  %359 = vmatpush1.bf16.msra.mxu1 %v985_v28 }
  0x50   :  { %317 = vmatprep.subr.bf16.mxu0 %v986_v29  ;;  %360 = vmatprep.subr.bf16.mxu1 %v988_v30 }
  0x53   :  { %318 = vmatpush1.bf16.msra.mxu0 %v990_v31  ;;  %361 = vmatpush1.bf16.msra.mxu1 %v991_v32 }
  0x54   :  { %888 = vmatprep.subr.bf16.mxu0 %v993_v34  ;;  %910 = vmatprep.subr.bf16.mxu1 %v994_v35 }
  0x56   :  { %336 = vmatmul.mubr.bf16.vlgmr.msra.gmra.mxu0 %v992_v33  ;;  %379 = vmatmul.mubr.bf16.vlgmr.msra.gmra.mxu1 %v992_v33 }
  0x57   :  { %889 = vmatpush3.bf16.msra.mxu0 %v995_v36  ;;  %911 = vmatpush3.bf16.msra.mxu1 %v996_v37 }
  0x58   :  { %890 = vmatprep.subr.bf16.mxu0 %v997_v38  ;;  %912 = vmatprep.subr.bf16.mxu1 %v998_v39 }
  0x5b   :  { %891 = vmatpush3.bf16.msra.mxu0 %v999_v40  ;;  %913 = vmatpush3.bf16.msra.mxu1 %v1000_v41 }
  0x5c   :  { %892 = vmatprep.subr.bf16.mxu0 %v1001_v42  ;;  %914 = vmatprep.subr.bf16.mxu1 %v1002_v43 }
  0x5f   :  { %893 = vmatpush3.bf16.msra.mxu0 %v1003_v44  ;;  %915 = vmatpush3.bf16.msra.mxu1 %v1004_v45 }
  0x60   :  { %894 = vmatprep.subr.bf16.mxu0 %v1005_v46  ;;  %916 = vmatprep.subr.bf16.mxu1 %v1006_v47 }
  0x63   :  { %895 = vmatpush3.bf16.msra.mxu0 %v1007_v48  ;;  %917 = vmatpush3.bf16.msra.mxu1 %v1008_v49 }
  0x64   :  { %896 = vmatprep.subr.bf16.mxu0 %v1009_v50  ;;  %918 = vmatprep.subr.bf16.mxu1 %v1010_v51 }
  0x67   :  { %897 = vmatpush3.bf16.msra.mxu0 %v1011_v52  ;;  %919 = vmatpush3.bf16.msra.mxu1 %v1012_v53 }
  0x68   :  { %898 = vmatprep.subr.bf16.mxu0 %v1013_v54  ;;  %920 = vmatprep.subr.bf16.mxu1 %v1014_v55 }
  0x6b   :  { %899 = vmatpush3.bf16.msra.mxu0 %v1015_v56  ;;  %921 = vmatpush3.bf16.msra.mxu1 %v1016_v57 }
  0x6c   :  { %900 = vmatprep.subr.bf16.mxu0 %v1017_v58  ;;  %922 = vmatprep.subr.bf16.mxu1 %v1018_v59 }
  0x6f   :  { %901 = vmatpush3.bf16.msra.mxu0 %v1019_v60  ;;  %923 = vmatpush3.bf16.msra.mxu1 %v1020_v61 }
  0x70   :  { %902 = vmatprep.subr.bf16.mxu0 %v1021_v62  ;;  %924 = vmatprep.subr.bf16.mxu1 %v1022_v63 }
  0x73   :  { %903 = vmatpush3.bf16.msra.mxu0 %v1023_v0  ;;  %925 = vmatpush3.bf16.msra.mxu1 %v1024_v1 }
 0x116   :  { %v337_v11 = vpop.f32.mrf.mxu0  ;;  %v380_v12 = vpop.f32.mrf.mxu1 }
 0x117   :  { %v338_v15 = vadd.f32 %v337_v11, %v120_v9  ;;  %v381_v16 = vadd.f32 %v380_v12, %v128_v10 }
 0x118   :  { %v339_v17 = vpop.f32.mrf.mxu0  ;;  %v382_v18 = vpop.f32.mrf.mxu1 }
 0x119   :  { %v397_v19 = vmul.f32 0.70710677, %v338_v15  ;;  %v399_v20 = vmul.f32 0.70710677, %v381_v16  ;;  %v340_v21 = vadd.f32 %v339_v17, %v124_v13  ;;  %v383_v22 = vadd.f32 %v382_v18, %v132_v14 }
 0x11a   :  { %v341_v23 = vpop.f32.mrf.mxu0  ;;  %v384_v24 = vpop.f32.mrf.mxu1  ;;  %v389_v43 = vmul.f32 0.5, %v338_v15  ;;  %v391_v61 = vmul.f32 0.5, %v381_v16  ;;  %v887_v16 = vld [vmem:[%s1217_s4] ss:$0 sm:$0xff]  ;;  %s1125_s4 = scalar_lea.vmem %s809_s16, 256 }
 0x11b   :  { %v342_v25 = vadd.f32 %v341_v23, %v120_v9  ;;  %v385_v26 = vadd.f32 %v384_v24, %v128_v10  ;;  %1025 = verf.f32 %v397_v19  ;;  %v398_v27 = vmul.f32 0.70710677, %v340_v21  ;;  %p1126_p6 = scmp.ne.s32.totalorder %s809_s16, %s1125_s4  ;;  %p1131_p8 = scmp.lt.s32.totalorder %s1125_s4, %s1125_s4 }
 0x11c   :  { %v343_v28 = vpop.f32.mrf.mxu0  ;;  %v386_v29 = vpop.f32.mrf.mxu1  ;;  %1027 = verf.f32 %v399_v20  ;;  %v400_v30 = vmul.f32 0.70710677, %v383_v22  ;;  %v390_v44 = vmul.f32 0.5, %v340_v21  ;;  %v392_v57 = vmul.f32 0.5, %v383_v22 }
 0x11d   :  { %v401_v31 = vmul.f32 0.70710677, %v342_v25  ;;  %1029 = verf.f32 %v398_v27  ;;  %v403_v32 = vmul.f32 0.70710677, %v385_v26  ;;  %v344_v33 = vadd.f32 %v343_v28, %v124_v13  ;;  %p1132_p9 = por %p1131_p8, %p1130_p7 }
 0x11e   :  { %v387_v34 = vadd.f32 %v386_v29, %v132_v14  ;;  %1031 = verf.f32 %v400_v30  ;;  %v393_v50 = vmul.f32 0.5, %v342_v25  ;;  %v395_v54 = vmul.f32 0.5, %v385_v26 }
 0x11f   :  { %1033 = verf.f32 %v401_v31  ;;  %v402_v35 = vmul.f32 0.70710677, %v344_v33  ;;  %v394_v55 = vmul.f32 0.5, %v344_v33  ;;  %p1133_p10 = pnand %p1132_p9, %p1126_p6 }
 0x120   :  { %1035 = verf.f32 %v403_v32  ;;  %v404_v36 = vmul.f32 0.70710677, %v387_v34  ;;  %v396_v59 = vmul.f32 0.5, %v387_v34 }
 0x121   :  { %1037 = verf.f32 %v402_v35 }
 0x122   :  { %1039 = verf.f32 %v404_v36 }
 0x128   :  { %v1026_v37 = vpop.eup %1025 }
 0x129   :  { %v1028_v38 = vpop.eup %1027  ;;  %v413_v48 = vadd.f32 1.0, %v1026_v37 }
 0x12a   :  { %v1030_v39 = vpop.eup %1029  ;;  %v415_v53 = vadd.f32 1.0, %v1028_v38 }
 0x12b   :  { %v1032_v40 = vpop.eup %1031  ;;  %v414_v45 = vadd.f32 1.0, %v1030_v39  ;;  %v421_v1 = vmul.f32 %v413_v48, %v389_v43 }
 0x12c   :  { %v1034_v41 = vpop.eup %1033  ;;  %v416_v49 = vadd.f32 1.0, %v1032_v40  ;;  %v423_v4 = vmul.f32 %v415_v53, %v391_v61 }
 0x12d   :  { %v1036_v42 = vpop.eup %1035  ;;  %v417_v46 = vadd.f32 1.0, %v1034_v41  ;;  %v422_v62 = vmul.f32 %v414_v45, %v390_v44 }
 0x12e   :  { %v1038_v47 = vpop.eup %1037  ;;  %v419_v51 = vadd.f32 1.0, %v1036_v42  ;;  %v424_v2 = vmul.f32 %v416_v49, %v392_v57 }
 0x12f   :  { %v1040_v52 = vpop.eup %1039  ;;  %v418_v56 = vadd.f32 1.0, %v1038_v47  ;;  %v425_v58 = vmul.f32 %v417_v46, %v393_v50 }
 0x130   :  { %v420_v60 = vadd.f32 1.0, %v1040_v52  ;;  %v427_v63 = vmul.f32 %v419_v51, %v395_v54 }
 0x131   :  { %v426_v0 = vmul.f32 %v418_v56, %v394_v55  ;;  %v431_v6 = vpack.c.bf16 %v425_v58, %v421_v1 }
 0x132   :  { %v428_v3 = vmul.f32 %v420_v60, %v396_v59  ;;  %v433_v8 = vpack.c.bf16 %v427_v63, %v423_v4 }
 0x133   :  { %v432_v5 = vpack.c.bf16 %v426_v0, %v422_v62 }
 0x134   :  { %v434_v7 = vpack.c.bf16 %v428_v3, %v424_v2 }
 0x135   :  { %723 = vmatprep.mubr.bf16.mxu0 %v432_v5 }
 0x136   :  { %764 = vmatprep.mubr.bf16.mxu1 %v434_v7  ;;  %724 = vmatmul.mubr.bf16.vlgmr.msra.gmra.mxu0 %v431_v6 }
 0x137   :  { %765 = vmatmul.mubr.bf16.vlgmr.msra.gmra.mxu1 %v433_v8 }
 0x1f6   :  { %v904_v9 = vpop.f32.mrf.mxu0 }
 0x1f7   :  { %v926_v10 = vpop.f32.mrf.mxu1 }
 0x1f8   :  { %v905_v11 = vpop.f32.mrf.mxu0 }
 0x1f9   :  { %v906_v12 = vadd.f32 %v905_v11, %v904_v9  ;;  %v927_v13 = vpop.f32.mrf.mxu1 }
 0x1fa   :  { %v928_v14 = vadd.f32 %v927_v13, %v926_v10  ;;  %v907_v15 = vpop.f32.mrf.mxu0 }
 0x1fb   :  { %v929_v17 = vpop.f32.mrf.mxu1 }
 0x1fc   :  { %v767_v18 = vadd.f32 %v928_v14, %v906_v12  ;;  %v908_v19 = vpop.f32.mrf.mxu0 }
 0x1fd   :  { %v909_v20 = vadd.f32 %v908_v19, %v907_v15  ;;  %v930_v21 = vpop.f32.mrf.mxu1 }
 0x1fe   :  { %v789_v22 = vadd.f32 %v887_v16, %v767_v18  ;;  %v931_v23 = vadd.f32 %v930_v21, %v929_v17 }
 0x200   :  { %v793_v24 = vmul.f32 0.70710677, %v789_v22  ;;  %v770_v25 = vadd.f32 %v931_v23, %v909_v20  ;;  %v791_v29 = vmul.f32 0.5, %v789_v22 }
 0x202   :  { %1041 = verf.f32 %v793_v24  ;;  %v790_v26 = vadd.f32 %v887_v16, %v770_v25 }
 0x204   :  { %v794_v27 = vmul.f32 0.70710677, %v790_v26  ;;  %v792_v33 = vmul.f32 0.5, %v790_v26 }
 0x206   :  { %1043 = verf.f32 %v794_v27 }
 0x20f   :  { %v1042_v28 = vpop.eup %1041 }
 0x210   :  { %v797_v30 = vadd.f32 1.0, %v1042_v28 }
 0x212   :  { %v799_v31 = vmul.f32 %v797_v30, %v791_v29 }
 0x213   :  { %v1044_v32 = vpop.eup %1043 }
 0x214   :  { %801 = vst [vmem:[#allocation11] sm:$0xff] %v799_v31  ;;  %v798_v34 = vadd.f32 1.0, %v1044_v32 }
 0x216   :  { %v800_v35 = vmul.f32 %v798_v34, %v792_v33 }
 0x218   :  { %802 = vst [vmem:[#allocation11 + $0x8] sm:$0xff] %v800_v35 }
 0x219   :  { %1136 = shalt.err (!%p1133_p10)
}
 0x21a   :  { %s1163_s17 = smov 128   ;;  %s1164_s18 = smov 8  }
 0x21b   :  { %814 = dma.vmem_to_hbm [thread:$0]  %s809_s16, 256, %s1218_s5, [#allocation5], %s1163_s17, %s1163_s17, %s1164_s18  }
 0x21c   :  { %1151 = dma.done.wait [#allocation5], 256  }
 0x21d   :  { %1152 = vsyncadd [#allocation5], 4294967040 }
 0x21e   :  { %818 = vsyncpa [#allocation4], 1 }
 0x21f   :  { %819 = vsyncpa [#allocation7], 1 }
 0x220   :  { %820 = vsyncpa [#allocation10], 1 }
 0x221   :  { %821 = vsyncpa [#allocation5], 1 }

</bundles_post_ra>
